<compile_context>
chip_gen: v7x
topology: tpu7x:2x2x1
jax: 0.10.0
libtpu: 0.0.40
codegen_flags: <defaults>
</compile_context>

<pallas_src>
import functools

import jax
import jax.numpy as jnp
from jax.experimental import pallas as pl
from jax.experimental.pallas import tpu as pltpu


def _psaa4_pool_kernel(x_ref, w_ref, scale_ref, shift_ref, o_ref, acc_ref,
                       *, inv_hw, hw, hw_t, tail):
    # x_ref:     (1, Cin, HW_T)  one batch element, one spatial tile (NCHW-flat)
    # w_ref:     (Cin, Cout)     1x1 conv weight, pre-transposed (native dtype)
    # scale_ref: (1, Cout) f32   folded BatchNorm scale  gamma / sqrt(var + eps)
    # shift_ref: (1, Cout) f32   folded BatchNorm shift  beta - mean * scale
    # o_ref:     (1, 1, Cout)    pooled -> conv -> BN -> ReLU row (lane-dense)
    # acc_ref:   (Cin, 1) f32    running spatial sum (persists across HW tiles)
    t = pl.program_id(1)

    @pl.when(t == 0)
    def _():
        acc_ref[...] = jnp.zeros_like(acc_ref)

    x = x_ref[0].astype(jnp.float32)                       # (Cin, HW_T)
    if tail:
        # cdiv grid: columns past `hw` hold unspecified data — mask them to 0.
        # (cmp/select cost is hidden under the DMA on this HBM-bound kernel.)
        col = t * hw_t + jax.lax.broadcasted_iota(jnp.int32, x.shape, 1)
        x = jnp.where(col < hw, x, 0.0)
    # Exact-f32 lane-axis reduce (VPU/XLU); no MXU, no per-step constants.
    acc_ref[...] += jnp.sum(x, axis=1, keepdims=True)

    @pl.when(t == pl.num_programs(1) - 1)
    def _():
        mean = acc_ref[...] * inv_hw                        # (Cin, 1) f32
        # 1x1 conv as mean^T @ W^T : (1, Cin) x (Cin, Cout) -> (1, Cout).
        lhs = mean.astype(w_ref.dtype)
        prec = (jax.lax.Precision.HIGHEST
                if w_ref.dtype == jnp.float32 else jax.lax.Precision.DEFAULT)
        y = jax.lax.dot_general(
            lhs, w_ref[...],
            dimension_numbers=(((0,), (0,)), ((), ())),     # contract Cin (trans-lhs)
            precision=prec,
            preferred_element_type=jnp.float32)             # (1, Cout) f32
        # Eval-mode BatchNorm (folded) + ReLU, all lane-dense.
        y = y * scale_ref[...] + shift_ref[...]
        y = jnp.maximum(y, 0.0)
        o_ref[0] = y.astype(o_ref.dtype)                    # unmasked full-lane store


def _vmem_capacity_bytes():
    """Generation-aware VMEM capacity; conservative fallback works everywhere."""
    try:
        get_info = getattr(pltpu, "get_tpu_info", None)
        if get_info is not None:
            cap = getattr(get_info(), "vmem_capacity_bytes", None)
            if cap:
                return int(cap)
    except Exception:
        pass
    return 64 << 20  # v7x-sized fallback; safe (smallest) assumption


def _pick_hw_tile(hw, cin, itemsize, x_window_budget_bytes):
    """Choose the spatial tile (last-dim block) for the reduction.

    Returns (hw_t, n_t, tail) where `tail` means hw % hw_t != 0 and the last
    tile must be masked in-kernel.
    """
    padded_hw = pl.cdiv(hw, 128) * 128
    per_buf = max(x_window_budget_bytes // 2, 1)     # x window is double-buffered
    # Whole (Cin, HW) slab fits: one fully contiguous DMA per batch element,
    # fewest grid steps, no masking.  (Full-extent last-dim block is always legal.)
    if cin * hw * itemsize <= per_buf:
        return hw, 1, False
    # Largest 128-aligned tile under the per-buffer budget ...
    fit_t = (per_buf // (cin * itemsize)) // 128 * 128
    # ... but keep each of the Cin strided DMA rows >= 2 KiB contiguous
    # (512 cols for f32, 1024 for bf16).
    min_t = max(128, pl.cdiv(2048, itemsize * 128) * 128)
    hw_t = min(padded_hw, max(fit_t, min_t))
    hw_t = max(hw_t, 128)
    # Never let the min-row floor blow the window past ~2x the budget.
    while hw_t > 128 and 2 * cin * hw_t * itemsize > 2 * x_window_budget_bytes:
        hw_t -= 128
    n_t = pl.cdiv(hw, hw_t)
    return hw_t, n_t, (hw % hw_t != 0)


def psaa4_pooling(x_nchw, conv_w, bn_gamma, bn_beta, bn_mean, bn_var, eps=1e-5,
                  x_window_budget_bytes=None):
    """x_nchw: (B, Cin, H, W).  conv_w: (Cout, Cin) [or (Cout, Cin, 1, 1)] 1x1 conv weight."""
    bs, cin, h, w = x_nchw.shape
    cout = conv_w.shape[0]
    hw = h * w
    itemsize = jnp.dtype(x_nchw.dtype).itemsize

    # Fold eval-mode BatchNorm into per-channel scale/shift, laid out as
    # (1, Cout) rows to match the lane-dense (1, Cout) conv output in-kernel.
    scale = (bn_gamma.astype(jnp.float32)
             / jnp.sqrt(bn_var.astype(jnp.float32) + eps))
    shift = bn_beta.astype(jnp.float32) - bn_mean.astype(jnp.float32) * scale
    scale2 = scale.reshape(1, cout)
    shift2 = shift.reshape(1, cout)
    # Pre-transposed weight (Cin, Cout), kept in its native dtype (bf16 stays bf16).
    w_t = conv_w.reshape(cout, -1).T

    # Free reshape of the NCHW layout — no transpose, no extra HBM traffic.
    x_flat = x_nchw.reshape(bs, cin, hw)

    # Generation-aware tiling + explicit VMEM limit.
    cap = _vmem_capacity_bytes()
    if x_window_budget_bytes is None:
        x_window_budget_bytes = max(cap // 4, 4 << 20)   # total for 2 x-buffers
    hw_t, n_t, tail = _pick_hw_tile(hw, cin, itemsize, x_window_budget_bytes)
    inv_hw = 1.0 / float(hw)

    x_window_bytes = 2 * cin * hw_t * itemsize
    vmem_limit = max(min(x_window_bytes + (8 << 20), int(cap * 0.9)), 16 << 20)

    cost = pl.CostEstimate(
        flops=2 * bs * cin * hw + 2 * bs * cin * cout,
        transcendentals=0,
        bytes_accessed=(bs * cin * hw * itemsize
                        + cin * cout * jnp.dtype(w_t.dtype).itemsize
                        + bs * cout * itemsize))

    # NOTE: if VMEM pressure ever forces hw_t below ~1024 on v7x, adding
    # pipeline_mode=pl.Buffered(3) to the x BlockSpec hides the extra DMA latency.
    pooled = pl.pallas_call(
        functools.partial(_psaa4_pool_kernel,
                          inv_hw=inv_hw, hw=hw, hw_t=hw_t, tail=tail),
        out_shape=jax.ShapeDtypeStruct((bs, 1, cout), x_nchw.dtype),
        grid_spec=pltpu.PrefetchScalarGridSpec(
            num_scalar_prefetch=0,
            grid=(bs, n_t),
            in_specs=[
                pl.BlockSpec((1, cin, hw_t), lambda b, t: (b, 0, t)),
                pl.BlockSpec((cin, cout), lambda b, t: (0, 0)),
                pl.BlockSpec((1, cout), lambda b, t: (0, 0)),
                pl.BlockSpec((1, cout), lambda b, t: (0, 0)),
            ],
            out_specs=pl.BlockSpec((1, 1, cout), lambda b, t: (b, 0, 0)),
            scratch_shapes=[pltpu.VMEM((cin, 1), jnp.float32)],
        ),
        compiler_params=pltpu.CompilerParams(
            dimension_semantics=("parallel", "arbitrary"),
            vmem_limit_bytes=int(vmem_limit)),
        cost_estimate=cost,
    )(x_flat, w_t, scale2, shift2)

    # .expand(bs, out_chs, h, w): broadcast lazily in XLA (the (B,Cout,H,W)
    # tensor is never materialized by the kernel; XLA fuses it downstream).
    return jnp.broadcast_to(pooled.reshape(bs, cout, 1, 1), (bs, cout, h, w))


def _reference(x_nchw, conv_w, bn_gamma, bn_beta, bn_mean, bn_var, eps=1e-5):
    # Pure-JAX reference mirroring the PyTorch forward (eval-mode BN).
    pooled = jnp.mean(x_nchw, axis=(2, 3))                       # (B, Cin)
    y = pooled @ conv_w.reshape(conv_w.shape[0], -1).T           # (B, Cout)
    y = (y - bn_mean) / jnp.sqrt(bn_var + eps) * bn_gamma + bn_beta
    y = jnp.maximum(y, 0.0)
    bs, cout = y.shape
    h, w = x_nchw.shape[2], x_nchw.shape[3]
    return jnp.broadcast_to(y[:, :, None, None], (bs, cout, h, w))


def _run_case(key, bs, cin, cout, h, w, budget=None, tol=1e-5):
    k1, k2, k3, k4, k5, k6 = jax.random.split(key, 6)
    x = jax.random.normal(k1, (bs, cin, h, w), dtype=jnp.float32)
    conv_w = jax.random.normal(k2, (cout, cin), dtype=jnp.float32) * 0.1
    bn_gamma = 1.0 + 0.1 * jax.random.normal(k3, (cout,), dtype=jnp.float32)
    bn_beta = 0.1 * jax.random.normal(k4, (cout,), dtype=jnp.float32)
    bn_mean = 0.05 * jax.random.normal(k5, (cout,), dtype=jnp.float32)
    bn_var = jnp.abs(jax.random.normal(k6, (cout,), dtype=jnp.float32)) + 0.5

    out = psaa4_pooling(x, conv_w, bn_gamma, bn_beta, bn_mean, bn_var,
                        x_window_budget_bytes=budget)
    out = jax.block_until_ready(out)
    ref = _reference(x, conv_w, bn_gamma, bn_beta, bn_mean, bn_var)
    assert out.shape == (bs, cout, h, w)
    assert jnp.allclose(out, ref, atol=tol, rtol=tol), "mismatch vs reference"


if __name__ == "__main__":
    key = jax.random.PRNGKey(0)
    k_a, k_b = jax.random.split(key)

    # Case 1: small shapes, single full-extent tile path (no masking).
    _run_case(k_a, bs=2, cin=4, cout=8, h=16, w=16)

    # Case 2: non-128-divisible HW (40*40 = 1600) with a deliberately tiny
    # x-window budget to exercise the tiled reduction + tail-masking path.
    _run_case(k_b, bs=2, cin=8, cout=16, h=40, w=40, budget=16 << 10, tol=1e-4)

    print("KERNEL_OK")
</pallas_src>

<mosaic_0001>
module attributes {stable_mosaic.version = 11 : i64} {
  func.func @_psaa4_pool_kernel(%arg0: i32, %arg1: i32, %arg2: memref<1x4x256xf32, #tpu.memory_space<vmem>>, %arg3: memref<4x8xf32, #tpu.memory_space<vmem>>, %arg4: memref<1x8xf32, #tpu.memory_space<vmem>>, %arg5: memref<1x8xf32, #tpu.memory_space<vmem>>, %arg6: memref<1x1x8xf32, #tpu.memory_space<vmem>>, %arg7: memref<4x1xf32, #tpu.memory_space<vmem>>) attributes {dimension_semantics = [#tpu.dimension_semantics<parallel>, #tpu.dimension_semantics<arbitrary>], iteration_bounds = array<i64: 2, 1>, scalar_prefetch = 0 : i64, scratch_operands = 1 : i64, tpu.core_type = #tpu.core_type<tc>, window_params = [{transform_indices = @transform_0, window_bounds = array<i64: 1, 4, 256>}, {pipeline_mode = #tpu.pipeline_mode<synchronous>, transform_indices = @transform_1, window_bounds = array<i64: 4, 8>}, {pipeline_mode = #tpu.pipeline_mode<synchronous>, transform_indices = @transform_2, window_bounds = array<i64: 1, 8>}, {pipeline_mode = #tpu.pipeline_mode<synchronous>, transform_indices = @transform_3, window_bounds = array<i64: 1, 8>}, {transform_indices = @transform_4, window_bounds = array<i64: 1, 1, 8>}]} {
    %c0_i32 = arith.constant 0 : i32
    %0 = arith.cmpi eq, %arg1, %c0_i32 : i32
    %1 = arith.extui %0 : i1 to i32
    %c0_i32_0 = arith.constant 0 : i32
    %2 = arith.cmpi ne, %1, %c0_i32_0 : i32
    scf.if %2 {
      %cst_9 = arith.constant 0.000000e+00 : f32
      %13 = vector.broadcast %cst_9 : f32 to vector<4x1xf32>
      %c0_10 = arith.constant 0 : index
      %c0_11 = arith.constant 0 : index
      %14 = vector.load %arg7[%c0_10, %c0_11] : memref<4x1xf32, #tpu.memory_space<vmem>>, vector<4x1xf32>
      tpu.vector_store %arg7[%c0_10, %c0_11], %13 {strides = array<i32>} : memref<4x1xf32, #tpu.memory_space<vmem>>, vector<4x1xf32>,
    } else {
    }
    %c0 = arith.constant 0 : index
    %c0_1 = arith.constant 0 : index
    %c0_2 = arith.constant 0 : index
    %3 = vector.load %arg2[%c0, %c0_1, %c0_2] : memref<1x4x256xf32, #tpu.memory_space<vmem>>, vector<1x4x256xf32>
    %4 = vector.shape_cast %3 : vector<1x4x256xf32> to vector<4x256xf32>
    %c0_3 = arith.constant 0 : index
    %c0_4 = arith.constant 0 : index
    %5 = vector.load %arg7[%c0_3, %c0_4] : memref<4x1xf32, #tpu.memory_space<vmem>>, vector<4x1xf32>
    %cst = arith.constant dense<0.000000e+00> : vector<4xf32>
    %6 = vector.multi_reduction <add>, %4, %cst [1] : vector<4x256xf32> to vector<4xf32>
    %7 = vector.shape_cast %6 : vector<4xf32> to vector<4x1xf32>
    %8 = arith.addf %5, %7 : vector<4x1xf32>
    %c0_5 = arith.constant 0 : index
    %c0_6 = arith.constant 0 : index
    %9 = vector.load %arg7[%c0_5, %c0_6] : memref<4x1xf32, #tpu.memory_space<vmem>>, vector<4x1xf32>
    tpu.vector_store %arg7[%c0_5, %c0_6], %8 {strides = array<i32>} : memref<4x1xf32, #tpu.memory_space<vmem>>, vector<4x1xf32>,
    %c0_i32_7 = arith.constant 0 : i32
    %10 = arith.cmpi eq, %arg1, %c0_i32_7 : i32
    %11 = arith.extui %10 : i1 to i32
    %c0_i32_8 = arith.constant 0 : i32
    %12 = arith.cmpi ne, %11, %c0_i32_8 : i32
    scf.if %12 {
      %c0_9 = arith.constant 0 : index
      %c0_10 = arith.constant 0 : index
      %13 = vector.load %arg7[%c0_9, %c0_10] : memref<4x1xf32, #tpu.memory_space<vmem>>, vector<4x1xf32>
      %cst_11 = arith.constant 3.906250e-03 : f32
      %14 = vector.broadcast %cst_11 : f32 to vector<4x1xf32>
      %15 = arith.mulf %13, %14 : vector<4x1xf32>
      %c0_12 = arith.constant 0 : index
      %c0_13 = arith.constant 0 : index
      %16 = vector.load %arg3[%c0_12, %c0_13] : memref<4x8xf32, #tpu.memory_space<vmem>>, vector<4x8xf32>
      %cst_14 = arith.constant dense<0.000000e+00> : vector<1x8xf32>
      %17 = tpu.matmul %15, %16, %cst_14 {dimension_numbers = #tpu.dot_dimension_numbers<[0], [0], [1], [1], [0, 1, 1, 1], [], []>, precision = #tpu.contract_precision<fp32>} : vector<4x1xf32>, vector<4x8xf32>, vector<1x8xf32> -> vector<1x8xf32>
      %c0_15 = arith.constant 0 : index
      %c0_16 = arith.constant 0 : index
      %18 = vector.load %arg4[%c0_15, %c0_16] : memref<1x8xf32, #tpu.memory_space<vmem>>, vector<1x8xf32>
      %19 = arith.mulf %17, %18 : vector<1x8xf32>
      %c0_17 = arith.constant 0 : index
      %c0_18 = arith.constant 0 : index
      %20 = vector.load %arg5[%c0_17, %c0_18] : memref<1x8xf32, #tpu.memory_space<vmem>>, vector<1x8xf32>
      %21 = arith.addf %19, %20 : vector<1x8xf32>
      %cst_19 = arith.constant 0.000000e+00 : f32
      %22 = vector.broadcast %cst_19 : f32 to vector<1x8xf32>
      %23 = arith.maximumf %21, %22 : vector<1x8xf32>
      %c0_20 = arith.constant 0 : index
      %c0_21 = arith.constant 0 : index
      %c0_22 = arith.constant 0 : index
      %24 = vector.load %arg6[%c0_20, %c0_21, %c0_22] : memref<1x1x8xf32, #tpu.memory_space<vmem>>, vector<1x1x8xf32>
      %25 = vector.shape_cast %24 : vector<1x1x8xf32> to vector<1x8xf32>
      %26 = vector.shape_cast %23 : vector<1x8xf32> to vector<1x1x8xf32>
      tpu.vector_store %arg6[%c0_20, %c0_21, %c0_22], %26 {strides = array<i32>} : memref<1x1x8xf32, #tpu.memory_space<vmem>>, vector<1x1x8xf32>,
    } else {
    }
    return
  }
  func.func @transform_0(%arg0: i32, %arg1: i32) -> (i32, i32, i32) {
    %c0_i32 = arith.constant 0 : i32
    %c0_i32_0 = arith.constant 0 : i32
    return %arg0, %c0_i32, %arg1 : i32, i32, i32
  }
  func.func @transform_1(%arg0: i32, %arg1: i32) -> (i32, i32) {
    %c0_i32 = arith.constant 0 : i32
    %c0_i32_0 = arith.constant 0 : i32
    %c0_i32_1 = arith.constant 0 : i32
    return %c0_i32, %c0_i32_0 : i32, i32
  }
  func.func @transform_2(%arg0: i32, %arg1: i32) -> (i32, i32) {
    %c0_i32 = arith.constant 0 : i32
    %c0_i32_0 = arith.constant 0 : i32
    %c0_i32_1 = arith.constant 0 : i32
    return %c0_i32, %c0_i32_0 : i32, i32
  }
  func.func @transform_3(%arg0: i32, %arg1: i32) -> (i32, i32) {
    %c0_i32 = arith.constant 0 : i32
    %c0_i32_0 = arith.constant 0 : i32
    %c0_i32_1 = arith.constant 0 : i32
    return %c0_i32, %c0_i32_0 : i32, i32
  }
  func.func @transform_4(%arg0: i32, %arg1: i32) -> (i32, i32, i32) {
    %c0_i32 = arith.constant 0 : i32
    %c0_i32_0 = arith.constant 0 : i32
    %c0_i32_1 = arith.constant 0 : i32
    return %arg0, %c0_i32, %c0_i32_0 : i32, i32, i32
  }
}

</mosaic_0001>

<bundles_post_ra>
// kernel: tpu_custom_call.1
= control target key start
LH: loop header
LB: loop body
LE: loop exit
PB: predicated region body
PF: predicated region fallthrough
CT: control target
= control target key end

     0   :  { %9 = vsyncpa [#allocation4], 0  ;;  %s1410_s0 = inlined_call_operand.hbm [shape: f32[2,4,256], index: 0, kind: input, shape index: {}]   ;;  %s1411_s1 = inlined_call_operand.hbm [shape: f32[4,8], index: 1, kind: input, shape index: {}]   ;;  %s1412_s2 = inlined_call_operand.vmem [shape: f32[1,8], index: 2, kind: input, shape index: {}]   ;;  %s1413_s3 = inlined_call_operand.vmem [shape: f32[1,8], index: 3, kind: input, shape index: {}]   ;;  %s1414_s4 = inlined_call_operand.hbm [shape: f32[2,1,8], index: 4, kind: output, shape index: {}]  }
   0x1   :  { %11 = vsyncpa [#allocation4 + $0x1], 0 }
   0x2   :  { %12 = vsyncpa [#allocation7], 0 }
   0x3   :  { %13 = vsyncpa [#allocation5], 0 }
   0x4   :  { %15 = vsyncpa [#allocation5 + $0x1], 0  ;;  %s1179_s15 = smov 0   ;;  %s1181_s16 = smov 0  }
   0x5   :  { %s1183_s17 = smov 0   ;;  %s1185_s18 = smov 0  }
   0x6   :  { %s1187_s19 = smov 0   ;;  %s1189_s20 = smov 0  }
   0x7 LB: > { %s861_s21 = sadd.s32 4294967295, %s1147_s20   ;;  %s862_s22 = sadd.s32 4294967294, %s1147_s20   ;;  %s1147_s20 = sphi %s1189_s20, %s21_s20   ;;  %s1143_s19 = sphi %s1187_s19, %s1439_s19   ;;  %s1139_s18 = sphi %s1185_s18, %s1438_s18   ;;  %s1135_s17 = sphi %s1183_s17, %s1437_s17   ;;  %s1131_s16 = sphi %s1181_s16, %s1436_s16   ;;  %s1127_s15 = sphi %s1179_s15, %s1435_s15  }
   0x8   : > { %p55_p0 = scmp.ne.s32.totalorder %s1131_s16, %s1127_s15  ;;  %p1213_p1 = scmp.eq.s32.totalorder %s861_s21, 0 }
   0x9   : > { %p1217_p2 = scmp.eq.s32.totalorder %s861_s21, 1  ;;  %p148_p3 = scmp.eq.s32.totalorder %s862_s22, 1 }
   0xa   : > { %s1419_s23 = scalar_select %p1213_p1, 1, 0 }
   0xb   : > { %s1420_s24 = scalar_select %p1217_p2, 1, 0 }
   0xc   : > { %p1223_p4 = por %p1213_p1, %p55_p0  ;;  %p863_p5 = scmp.ge.s32.totalorder %s1147_s20, 1 }
   0xd   : > { %p1228_p6 = por %p148_p3, %p55_p0  ;;  %p155_p7 = scmp.lt.s32.totalorder %s1147_s20, 3 }
   0xe   : > { %s1421_s25 = scalar_select %p1223_p4, 1, 0 }
   0xf   : > { %s1422_s26 = scalar_select %p1228_p6, 1, 0 }
  0x10   : > { %p1233_p8 = pnand %p863_p5, %p155_p7  ;;  %s1149_s28 = smov [#allocation6]  }
  0x11   : > { %s168_s29 = sshll.u32 %s1149_s28, 4  ;;  %s33_s5 = sadd.s32 1, %s1143_s19  ;;  %s169_s29 = int_to_ptr.vmem [resolvable:$true] %s168_s29 }
  0x12   : > { %s1423_s27 = scalar_select %p1233_p8, 1, 0 }
  0x13   : > { %p935_p10 = pneg %p1233_p8  ;;  %s42_s6 = sadd.s32 1, %s1135_s17 }
  0x14   : > { %p1248_p12 = scmp.ge.s32.totalorder %s33_s5, 2  ;;  %s1003_s10 = scalar_lea.hbm %s1411_s1, 64 }
  0x15   : > { %p1242_p11 = pnand %p935_p10, %p1213_p1  ;;  %p1004_p13 = scmp.ne.s32.totalorder %s1411_s1, %s1003_s10 }
  0x16   : > { %s1425_s7 = scalar_select %p1248_p12, 1, 0 }
  0x17   : > { %p1005_p0 = pneg %p1242_p11  ;;  %p1010_p7 = scmp.lt.u32.totalorder %s1003_s10, %s1411_s1 }
  0x19   : > { %p1006_p3 = pnand %p1005_p0, %p1004_p13 }
  0x1b   : > { %p1007_p5 = pneg %p1006_p3 }
  0x1d   : > { %p1012_p10 = pnand %p1010_p7, %p1007_p5 }
  0x1f   : > { %1015 = shalt.err (!%p1012_p10)
}
  0x20   : > { %s1016_s21 = scalar_lea.vmem %s169_s29, 64  ;;  %p1024_p4 = scmp.lt.s32.totalorder %s169_s29, %s169_s29 }
  0x21   : > { %p1017_p9 = scmp.ne.s32.totalorder %s169_s29, %s1016_s21  ;;  %p1025_p8 = scmp.lt.s32.totalorder %s1016_s21, %s1016_s21 }
  0x23   : > { %p1019_p6 = pnand %p1017_p9, %p1005_p0  ;;  %p1026_p2 = por %p1025_p8, %p1024_p4 }
  0x25   : > { %p1020_p1 = pneg %p1019_p6 }
  0x27   : > { %p1027_p12 = pnand %p1026_p2, %p1020_p1 }
  0x29   : > { %1030 = shalt.err (!%p1027_p12)
}
  0x2a   : > { %938 = dma.hbm_to_vmem [thread:$0]  (!%p1242_p11), %s1411_s1, 64, %s169_s29, [#allocation7]  }
  0x2b   : > { %p1426_p4 = scmp.ne.s32.totalorder %s1425_s7, 0  ;;  %p49_p1 = scmp.ne.s32.totalorder %s1135_s17, %s1131_s16 }
  0x2c   : > { %p50_p2 = scmp.eq.s32.totalorder %s1147_s20, 0  ;;  %p948_p6 = scmp.lt.s32.totalorder %s1147_s20, 2 }
  0x2d   : > { %s1441_s5 = smov (%p1426_p4, %s33_s5), 0  ;;  %p1427_p12 = scmp.ne.s32.totalorder %s1420_s24, 0 }
  0x2e   : > { %s37_s30 = ssub.s32 %s1143_s19, %s1441_s5  ;;  %p51_p9 = por %p50_p2, %p49_p1 }
  0x2f   : > { %p40_p8 = scmp.eq.s32.totalorder %s37_s30, 0  ;;  %p1280_p13 = por %p1427_p12, %p49_p1 }
  0x30   : > { %s185_s9 = sand.u32 1, %s1135_s17   ;;  %s875_s7 = sshll.u32 %s1143_s19, 7 }
  0x31   : > { %s1288_s10 = scalar_select %p40_p8, %s1135_s17, %s42_s6  }
  0x32   : > { %s866_s29 = sshll.u32 %s185_s9, 3  ;;  %s1294_s13 = scalar_lea.hbm %s1410_s0, %s875_s7 }
  0x33   : > { %s189_s24 = scalar_lea.vmem [#allocation3], %s866_s29  ;;  %p1298_p11 = pnand %p948_p6, %p51_p9 }
  0x34   : > { %s199_s14 = sshll.u32 %s189_s24, 4  ;;  %s186_s6 = scalar_lea.sflag [#allocation4], %s185_s9  ;;  %s1296_s14 = int_to_ptr.vmem [resolvable:$true] %s199_s14 }
  0x35   : > { %s1031_s22 = scalar_lea.hbm %s1294_s13, 128  ;;  %p1033_p3 = pneg %p1298_p11 }
  0x36   : > { %p1032_p0 = scmp.ne.s32.totalorder %s1294_s13, %s1031_s22  ;;  %s1036_s29 = scalar_lea.hbm %s1410_s0, 256 }
  0x37   : > { %p1037_p10 = scmp.lt.u32.totalorder %s1294_s13, %s1410_s0  ;;  %p1038_p4 = scmp.lt.u32.totalorder %s1036_s29, %s1031_s22 }
  0x38   : > { %p1034_p5 = pnand %p1033_p3, %p1032_p0  ;;  %p1040_p2 = scmp.lt.u32.totalorder %s1031_s22, %s1294_s13 }
  0x39   : > { %p1039_p1 = por %p1038_p4, %p1037_p10 }
  0x3a   : > { %p1035_p7 = pneg %p1034_p5 }
  0x3b   : > { %p1041_p6 = por %p1040_p2, %p1039_p1 }
  0x3d   : > { %p1042_p8 = pnand %p1041_p6, %p1035_p7 }
  0x3f   : > { %1045 = shalt.err (!%p1042_p8)
}
  0x40   : > { %s1046_s9 = scalar_lea.vmem %s1296_s14, 128  ;;  %s1150_s12 = smov [#allocation3]  }
  0x41   : > { %p1047_p9 = scmp.ne.s32.totalorder %s1296_s14, %s1046_s9  ;;  %s1051_s24 = sshll.u32 %s1150_s12, 4  ;;  %s1052_s24 = int_to_ptr.vmem [resolvable:$false] %s1051_s24 }
  0x42   : > { %s1053_s28 = scalar_lea.vmem %s1052_s24, 256  ;;  %p1054_p5 = scmp.lt.s32.totalorder %s1296_s14, %s1052_s24 }
  0x43   : > { %p1049_p12 = pnand %p1047_p9, %p1033_p3  ;;  %p1055_p10 = scmp.lt.s32.totalorder %s1053_s28, %s1046_s9 }
  0x45   : > { %p1050_p0 = pneg %p1049_p12  ;;  %p1056_p4 = por %p1055_p10, %p1054_p5 }
  0x47   : > { %p1057_p1 = pnand %p1056_p4, %p1050_p0 }
  0x49   : > { %1060 = shalt.err (!%p1057_p1)
}
  0x4a   : > { %942 = dma.hbm_to_vmem [thread:$0]  (!%p1298_p11), %s1294_s13, 128, %s1296_s14, %s186_s6  }
  0x4b   : > { %p1430_p7 = scmp.ne.s32.totalorder %s1423_s27, 0 }
  0x4c   : > { %s1330_s22 = sand.u32 (!%p1430_p7), 1, %s1131_s16   ;;  %p1431_p3 = scmp.ne.s32.totalorder (!%p1430_p7), %s1421_s25, 0 }
  0x4d   : > { %208 = sbr.rel (%p1430_p7) target bundleno = 639 (0x27f), region = 36  ;;  %s870_s30 = sshll.u32 (!%p1430_p7), %s1330_s22, 3 }
  0x4e   : > { %s211_s29 = scalar_lea.sflag (!%p1430_p7), [#allocation4], %s1330_s22  ;;  %s214_s7 = scalar_lea.vmem (!%p1430_p7), [#allocation3], %s870_s30 }
  0x54   : > { %1114 = dma.done.wait (%p1431_p3), %s211_s29, 128  }
  0x55   : > { %1116 = vsyncadd (%p1431_p3), %s211_s29, 4294967168  ;;  %p1432_p2 = scmp.ne.s32.totalorder %s1419_s23, 0 }
  0x57   : > { %1118 = dma.done.wait (%p1432_p2), [#allocation7], 64  }
  0x58   : > { %1120 = vsyncadd (%p1432_p2), [#allocation7], 4294967232  ;;  %vm247_vm0 = vcmask 3072   ;;  %v1151_v0 = vmov 0.0   ;;  %vm254_vm1 = vcmask 1043456   ;;  %v249_v1 = vld [vmem:[%s214_s7] sm:$0xff] }
  0x59   : > { %248 = vst.msk [vmem:[#allocation2] sm:$0xf] %vm247_vm0, %v1151_v0  ;;  %903 = vmatprep.subr.mxu0 %v1151_v0  ;;  %888 = vmatprep.subr.mxu1 %v1151_v0  ;;  %v268_v2 = vld [vmem:[#allocation6] sm:$0xf]  ;;  %v252_v3 = vcombine.high %v249_v1, %v249_v1  ;;  %v255_v4 = vsel %vm254_vm1, %v249_v1, 0.0  ;;  %vm1152_vm2 = vmmov 0  }
  0x5a   : > { %v306_v5 = vsel %vm254_vm1, %v268_v2, 0  ;;  %905 = vmatprep.mubr.msk.f32.mxu0 %vm1152_vm2, %v1151_v0  ;;  %890 = vmatprep.mubr.msk.f32.mxu1 %vm1152_vm2, %v1151_v0  ;;  %vm301_vm3 = vcmask 31744   ;;  %v754_v28 = vld [vmem:[%s1412_s2] sm:$0x1]  ;;  %s872_s14 = sshll.u32 %s1139_s18, 4  ;;  %s241_s21 = scalar_lea.vmem [#allocation8], %s1330_s22 }
  0x5b   : > { %v309_v6 = vand.u32 4294901760, %v306_v5  ;;  %v256_v7 = vsel %vm254_vm1, %v252_v3, 0.0  ;;  %v756_v31 = vld [vmem:[%s1413_s3] sm:$0x1]  ;;  %s774_s6 = sshll.u32 %s241_s21, 4  ;;  %vm759_vm4 = vcmask 57344   ;;  %s1361_s12 = scalar_lea.hbm %s1414_s4, %s872_s14  ;;  %s1363_s6 = int_to_ptr.vmem [resolvable:$true] %s774_s6 }
  0x5c   : > { %v257_v8 = vadd.f32 %v256_v7, %v255_v4  ;;  %s762_s24 = scalar_lea.sflag [#allocation5], %s1330_s22  ;;  %s1061_s28 = scalar_lea.vmem %s1363_s6, 16 }
  0x5d   : > { %904 = vmatpush3.msra.mxu0 %v309_v6  ;;  %889 = vmatpush3.msra.mxu1 %v309_v6  ;;  %v386_v14 = vsub.f32 %v306_v5, %v309_v6  ;;  %p1062_p11 = scmp.ne.s32.totalorder %s1363_s6, %s1061_s28  ;;  %s1153_s18 = smov [#allocation8]  }
  0x5e   : > { %893 = vmatprep.subr.mxu1 %v1151_v0  ;;  %908 = vmatprep.subr.mxu0 %v1151_v0  ;;  %s1065_s30 = sshll.u32 %s1153_s18, 4  ;;  %s1066_s30 = int_to_ptr.vmem [resolvable:$false] %s1065_s30 }
  0x5f   : > { %258 = vadd.xlane.f32.xlu0 %v257_v8  ;;  %v387_v17 = vand.u32 4294901760, %v386_v14  ;;  %p1063_p6 = pnand %p1062_p11, %p1280_p13  ;;  %s1067_s29 = scalar_lea.vmem %s1066_s30, 32 }
  0x60   : > { %v250_v9 = vld [vmem:[#allocation2] sm:$0xf]  ;;  %p1068_p9 = scmp.lt.s32.totalorder %s1363_s6, %s1066_s30  ;;  %p1069_p12 = scmp.lt.s32.totalorder %s1067_s29, %s1061_s28 }
  0x61   : > { %v388_v20 = vsub.f32 %v386_v14, %v387_v17  ;;  %p1064_p8 = pneg %p1063_p6 }
  0x62   : > { %p1070_p0 = por %p1069_p12, %p1068_p9 }
  0x63   : > { %v389_v23 = vand.u32 4294901760, %v388_v20 }
  0x64   : > { %p1071_p5 = pnand %p1070_p0, %p1064_p8 }
  0xec   : > { %v259_v10 = vpop.xlane.xlu0 %258 }
  0xed   : > { %v260_v11 = vadd.f32 %v259_v10, %v250_v9 }
  0xef   : > { %262 = vst.msk [vmem:[#allocation2] sm:$0xf] %vm247_vm0, %v260_v11 }
  0xf6   : > { %v266_v12 = vld [vmem:[#allocation2] sm:$0xf] }
  0xf7   : > { %v267_v13 = vmul.f32 0.00390625, %v266_v12 }
  0xf9   : > { %269 = vxpose.xlu0.b32.start.end [1/1] (short) (narrow) %v267_v13, 8 }
 0x179   : > { %v285_v15 = vpop.trf.xlu0 }
 0x17a   : > { %v303_v16 = vsel %vm301_vm3, %v285_v15, 0 }
 0x17b   : > { %v374_v18 = vand.u32 4294901760, %v303_v16 }
 0x17d   : > { %v375_v19 = vsub.f32 %v303_v16, %v374_v18 }
 0x17f   : > { %v376_v21 = vand.u32 4294901760, %v375_v19 }
 0x181   : > { %906 = vmatmul.mubr.f32.vlgmr.msra.gmra.mrb[0].mxu0 %v376_v21  ;;  %v377_v22 = vsub.f32 %v375_v19, %v376_v21 }
 0x182   : > { %909 = vmatpush3.msra.mxu0 %v387_v17  ;;  %910 = vmatprep.mubr.msk.f32.mxu0 %vm1152_vm2, %v1151_v0 }
 0x183   : > { %v378_v24 = vand.u32 4294901760, %v377_v22  ;;  %913 = vmatprep.subr.mxu0 %v1151_v0 }
 0x185   : > { %891 = vmatmul.mubr.f32.vlgmr.msra.gmra.mrb[0].mxu1 %v378_v24 }
 0x186   : > { %894 = vmatpush3.msra.mxu1 %v389_v23  ;;  %895 = vmatprep.mubr.msk.f32.mxu1 %vm1152_vm2, %v1151_v0 }
 0x187   : > { %898 = vmatprep.subr.mxu1 %v1151_v0 }
 0x189   : > { %911 = vmatmul.mubr.f32.vlgmr.msra.gmra.mrb[0].mxu0 %v374_v18 }
 0x18a   : > { %914 = vmatpush3.msra.mxu0 %v309_v6  ;;  %915 = vmatprep.mubr.msk.f32.mxu0 %vm1152_vm2, %v1151_v0 }
 0x18d   : > { %896 = vmatmul.mubr.f32.vlgmr.msra.gmra.mrb[0].mxu1 %v374_v18 }
 0x18e   : > { %899 = vmatpush3.msra.mxu1 %v386_v14  ;;  %900 = vmatprep.mubr.msk.f32.mxu1 %vm1152_vm2, %v1151_v0 }
 0x191   : > { %916 = vmatmul.mubr.f32.vlgmr.msra.gmra.mrb[0].mxu0 %v374_v18 }
 0x195   : > { %901 = vmatmul.mubr.f32.vlgmr.msra.gmra.mrb[0].mxu1 %v375_v19 }
 0x264   : > { %v750_v25 = vpop.f32.mrb[0].mxu0 }
 0x265   : > { %v917_v26 = vpop.f32.mrb[1].mxu0 }
 0x268   : > { %v530_v27 = vpop.f32.mrb[0].mxu1 }
 0x269   : > { %v918_v29 = vadd.f32 %v750_v25, %v530_v27  ;;  %v902_v30 = vpop.f32.mrb[1].mxu1 }
 0x26b   : > { %v755_v32 = vmul.f32 %v918_v29, %v754_v28 }
 0x26d   : > { %v757_v33 = vadd.f32 %v756_v31, %v755_v32 }
 0x26f   : > { %v758_v34 = vmax.f32 %v757_v33, 0.0 }
 0x271   : > { %760 = vst.msk [vmem:[%s241_s21] sm:$0x1] %vm759_vm4, %v758_v34 }
 0x272   : > { %1074 = shalt.err (!%p1071_p5)
}
 0x273   : > { %s1075_s22 = scalar_lea.hbm %s1361_s12, 16  ;;  %s1079_s25 = scalar_lea.hbm %s1414_s4, 32 }
 0x274   : > { %p1076_p10 = scmp.ne.s32.totalorder %s1361_s12, %s1075_s22  ;;  %p1080_p7 = scmp.lt.u32.totalorder %s1361_s12, %s1414_s4 }
 0x275   : > { %p1081_p3 = scmp.lt.u32.totalorder %s1079_s25, %s1075_s22  ;;  %p1083_p11 = scmp.lt.u32.totalorder %s1075_s22, %s1361_s12 }
 0x276   : > { %p1077_p4 = pnand %p1076_p10, %p1280_p13 }
 0x277   : > { %p1082_p2 = por %p1081_p3, %p1080_p7 }
 0x278   : > { %p1078_p1 = pneg %p1077_p4 }
 0x279   : > { %p1084_p6 = por %p1083_p11, %p1082_p2 }
 0x27b   : > { %p1085_p8 = pnand %p1084_p6, %p1078_p1 }
 0x27d   : > { %1088 = shalt.err (!%p1085_p8)
}
 0x27e   : > { %933 = dma.vmem_to_hbm [thread:$0]  (%p1280_p13), %s1363_s6, 16, %s1361_s12, %s762_s24  }
 0x27f PF: > { %s786_s14 = sand.u32 1, %s1127_s15   ;;  %p1433_p9 = scmp.ne.s32.totalorder %s1422_s26, 0 }
 0x280   : > { %p1434_p12 = scmp.ge.s32.totalorder %s1147_s20, 2  ;;  %s787_s21 = scalar_lea.sflag [#allocation5], %s786_s14 }
 0x282   : > { %p944_p0 = pnand %p1434_p12, %p1433_p9 }
 0x284   : > { %1122 = dma.done.wait (!%p944_p0), %s787_s21, 16  }
 0x285   : > { %1124 = vsyncadd (!%p944_p0), %s787_s21, 4294967280  ;;  %s21_s20 = sadd.s32 1, %s1147_s20   ;;  %s1435_s15 = smov %s1131_s16 }
 0x286   : > { %p18_p5 = scmp.ge.s32.totalorder %s21_s20, 4   ;;  %s1436_s16 = smov %s1135_s17 }
 0x287   : > { %s1437_s17 = smov %s1288_s10  ;;  %s1438_s18 = smov %s1143_s19 }
 0x288   : > { %s1439_s19 = smov %s1441_s5  ;;  %20 = sbr.rel (!%p18_p5) target bundleno = 7 (0x7), region = 93 }
 0x28f   :  { %791 = vsyncpa [#allocation4], 1 }
 0x290   :  { %793 = vsyncpa [#allocation4 + $0x1], 1 }
 0x291   :  { %794 = vsyncpa [#allocation7], 1 }
 0x292   :  { %795 = vsyncpa [#allocation5], 1 }
 0x293   :  { %797 = vsyncpa [#allocation5 + $0x1], 1 }

</bundles_post_ra>
